<compile_context>
chip_gen: v7x
topology: tpu7x:2x2x1
jax: 0.10.0
libtpu: 0.0.40
codegen_flags: <defaults>
</compile_context>

<pallas_src>
import jax
import jax.numpy as jnp
from jax.experimental import pallas as pl
from jax.experimental.pallas import tpu as pltpu


def _round_up(x, m):
    return (x + m - 1) // m * m


# ----------------------------------------------------------------------------
# parameter construction / packing
# ----------------------------------------------------------------------------
def make_params(key, d_in, hidden, z_dim):
    ks = jax.random.split(key, 10)
    s = 0.05
    return dict(
        we1=jax.random.normal(ks[0], (d_in, hidden), jnp.float32) * s,
        be1=jax.random.normal(ks[1], (1, hidden), jnp.float32) * s,
        wmu=jax.random.normal(ks[2], (hidden, z_dim), jnp.float32) * s,
        bmu=jax.random.normal(ks[3], (1, z_dim), jnp.float32) * s,
        wlv=jax.random.normal(ks[4], (hidden, z_dim), jnp.float32) * s,
        blv=jax.random.normal(ks[5], (1, z_dim), jnp.float32) * s,
        wd1=jax.random.normal(ks[6], (z_dim, hidden), jnp.float32) * s,
        bd1=jax.random.normal(ks[7], (1, hidden), jnp.float32) * s,
        wd2=jax.random.normal(ks[8], (hidden, d_in), jnp.float32) * s,
        bd2=jax.random.normal(ks[9], (1, d_in), jnp.float32) * s,
    )


def pack_params(params):
    """Pack all weights/biases into a single row-stacked VMEM slab.

    Layout (rows, all block starts 8-sublane aligned):
      rows 0..3 : be1 | bhd(=bmu|blv) | bd1 | bd2   (one bias per row, lane-padded)
      rows 4..7 : zero pad
      then we1, whd(=wmu|wlv), wd1, wd2 blocks, each padded to a multiple of 8 rows.
    """
    we1, be1 = params["we1"], params["be1"]
    wd1, bd1 = params["wd1"], params["bd1"]
    wd2, bd2 = params["wd2"], params["bd2"]
    whd = jnp.concatenate([params["wmu"], params["wlv"]], axis=1)   # [H, 2Z]
    bhd = jnp.concatenate([params["bmu"], params["blv"]], axis=1)   # [1, 2Z]

    D, H = we1.shape
    Z = params["wmu"].shape[1]
    LW = max(H, 2 * Z, D)                                           # slab lane width

    def pad_lanes(a):
        return jnp.pad(a, ((0, 0), (0, LW - a.shape[1])))

    bias_rows = jnp.concatenate(
        [pad_lanes(be1), pad_lanes(bhd), pad_lanes(bd1), pad_lanes(bd2)], axis=0)
    n_bias = _round_up(bias_rows.shape[0], 8)
    bias_rows = jnp.pad(bias_rows, ((0, n_bias - bias_rows.shape[0]), (0, 0)))

    blocks = [bias_rows]
    offsets = {}
    row = n_bias
    for name, w in (("we1", we1), ("whd", whd), ("wd1", wd1), ("wd2", wd2)):
        rows = _round_up(w.shape[0], 8)
        offsets[name] = (row, w.shape[0], w.shape[1])
        blocks.append(jnp.pad(pad_lanes(w), ((0, rows - w.shape[0]), (0, 0))))
        row += rows

    slab = jnp.concatenate(blocks, axis=0)                           # [rows, LW]
    meta = dict(D=D, H=H, Z=Z, LW=LW, offsets=offsets,
                bias_rows={"be1": 0, "bhd": 1, "bd1": 2, "bd2": 3})
    return slab, meta


# ----------------------------------------------------------------------------
# kernel
# ----------------------------------------------------------------------------
def _make_kernel(b_true, b_pad, meta, out_lanes):
    D, H, Z = meta["D"], meta["H"], meta["Z"]
    offs = meta["offsets"]
    brow = meta["bias_rows"]

    def kernel(feat_ref, p_ref, out_ref):
        x = feat_ref[...]                                            # [B_pad, D]

        def w(name):
            r0, nr, nc = offs[name]
            return p_ref[r0:r0 + nr, 0:nc]

        def b(name, nc):
            r0 = brow[name]
            return p_ref[r0:r0 + 1, 0:nc]

        # ---- encoder ----
        h = jnp.dot(x, w("we1"), preferred_element_type=jnp.float32) + b("be1", H)
        h = jnp.maximum(h, 0.0)                                      # [B_pad, H]
        # fused mu/log_var head: one MXU push, slice afterwards
        mulv = jnp.dot(h, w("whd"), preferred_element_type=jnp.float32) + b("bhd", 2 * Z)
        mu = mulv[:, :Z]                                             # [B_pad, Z]
        lv = mulv[:, Z:]                                             # [B_pad, Z]

        # ---- decoder (eval mode: z = mu, no sampling) ----
        hd = jnp.dot(mu, w("wd1"), preferred_element_type=jnp.float32) + b("bd1", H)
        hd = jnp.maximum(hd, 0.0)                                    # [B_pad, H]
        x_cons = jnp.dot(hd, w("wd2"), preferred_element_type=jnp.float32) + b("bd2", D)

        # ---- KLD reduction (2-D all the way; mask padded batch rows) ----
        per_sample = jnp.sum(1.0 + lv - mu * mu - jnp.exp(lv),
                             axis=-1, keepdims=True)                 # [B_pad, 1]
        row_idx = jax.lax.broadcasted_iota(jnp.int32, (b_pad, 1), 0)
        per_sample = jnp.where(row_idx < b_true, per_sample, 0.0)
        kld = jnp.sum(per_sample, axis=0, keepdims=True) * (-0.5 / b_true)   # [1, 1]
        reward = -(kld * 1e8)                                        # [1, 1]

        # ---- single lane-dense output slab: [x_cons | mu | lv | reward bcast] ----
        out_ref[:, 0:D] = x_cons
        out_ref[:, D:D + 2 * Z] = mulv
        out_ref[:, D + 2 * Z:] = jnp.broadcast_to(
            reward, (b_pad, out_lanes - D - 2 * Z))

    return kernel


# ----------------------------------------------------------------------------
# wrapper (equivalent of RewardModel.forward)
# ----------------------------------------------------------------------------
def reward_model_forward(feat, packed_params, meta):
    """Returns (reward_scalar, (x_cons, mu, log_var))."""
    feat = jnp.asarray(feat, jnp.float32)
    if feat.ndim == 1:                                   # feat.unsqueeze(0)
        feat = feat[None, :]
    B, D = feat.shape
    assert D == meta["D"]
    Z = meta["Z"]

    b_pad = _round_up(max(B, 1), 8)                      # align batch to 8 sublanes
    if b_pad != B:
        feat = jnp.pad(feat, ((0, b_pad - B), (0, 0)))

    out_lanes = _round_up(D + 2 * Z + 1, 128)            # lane-dense output slab
    kernel = _make_kernel(B, b_pad, meta, out_lanes)
    vmem = pl.BlockSpec(memory_space=pltpu.MemorySpace.VMEM)

    slab = pl.pallas_call(
        kernel,
        out_shape=jax.ShapeDtypeStruct((b_pad, out_lanes), jnp.float32),
        in_specs=[vmem, vmem],
        out_specs=vmem,
    )(feat, packed_params)

    x_cons = slab[:B, 0:D]
    mu = slab[:B, D:D + Z]
    log_var = slab[:B, D + Z:D + 2 * Z]
    reward = slab[0, D + 2 * Z]
    # TODO(synk): .cuda()/.cpu() device management from the torch module has no
    # Pallas equivalent; device placement is handled by JAX outside the kernel.
    return reward, (x_cons, mu, log_var)


if __name__ == "__main__":
    B, D_IN, HIDDEN, Z_DIM = 2, 32, 64, 16

    root = jax.random.PRNGKey(0)
    k_feat, k_params = jax.random.split(root)
    feat = jax.random.normal(k_feat, (B, D_IN), jnp.float32)
    params = make_params(k_params, D_IN, HIDDEN, Z_DIM)
    packed, meta = pack_params(params)                   # packed once, reused per call

    reward, (x_cons, mu, log_var) = reward_model_forward(feat, packed, meta)
    jax.block_until_ready(reward)
    reward_item = float(reward)                          # .item() equivalent

    # ---- cross-check against pure-JAX reference ----
    h = jnp.maximum(feat @ params["we1"] + params["be1"], 0.0)
    mu_r = h @ params["wmu"] + params["bmu"]
    lv_r = h @ params["wlv"] + params["blv"]
    hd_r = jnp.maximum(mu_r @ params["wd1"] + params["bd1"], 0.0)
    xc_r = hd_r @ params["wd2"] + params["bd2"]
    kld_ref = -0.5 * jnp.mean(jnp.sum(1 + lv_r - mu_r ** 2 - jnp.exp(lv_r), -1)) * 1e8
    reward_ref_val = float(-kld_ref)

    assert x_cons.shape == (B, D_IN)
    assert mu.shape == (B, Z_DIM)
    assert log_var.shape == (B, Z_DIM)
    assert jnp.isfinite(reward)
    assert abs(reward_item - reward_ref_val) <= 1e-3 * max(1.0, abs(reward_ref_val))
    assert jnp.allclose(mu, mu_r, atol=1e-4)
    assert jnp.allclose(log_var, lv_r, atol=1e-4)
    assert jnp.allclose(x_cons, xc_r, atol=1e-4)

    print("KERNEL_OK")
</pallas_src>

<mosaic_0001>
module attributes {stable_mosaic.version = 11 : i64} {
  func.func @kernel(%arg0: memref<8x32xf32, #tpu.memory_space<vmem>>, %arg1: memref<184x64xf32, #tpu.memory_space<vmem>>, %arg2: memref<8x128xf32, #tpu.memory_space<vmem>>) attributes {dimension_semantics = [], scalar_prefetch = 0 : i64, scratch_operands = 0 : i64, tpu.core_type = #tpu.core_type<tc>} {
    %c0 = arith.constant 0 : index
    %c0_0 = arith.constant 0 : index
    %0 = vector.load %arg0[%c0, %c0_0] : memref<8x32xf32, #tpu.memory_space<vmem>>, vector<8x32xf32>
    %c8 = arith.constant 8 : index
    %c0_1 = arith.constant 0 : index
    %1 = vector.load %arg1[%c8, %c0_1] : memref<184x64xf32, #tpu.memory_space<vmem>>, vector<32x64xf32>
    %cst = arith.constant dense<0.000000e+00> : vector<8x64xf32>
    %2 = tpu.matmul %0, %1, %cst {dimension_numbers = #tpu.dot_dimension_numbers<[1], [0], [0], [1], [0, 0, 1, 1], [], []>} : vector<8x32xf32>, vector<32x64xf32>, vector<8x64xf32> -> vector<8x64xf32>
    %c0_2 = arith.constant 0 : index
    %c0_3 = arith.constant 0 : index
    %3 = vector.load %arg1[%c0_2, %c0_3] : memref<184x64xf32, #tpu.memory_space<vmem>>, vector<1x64xf32>
    %4 = vector.broadcast %3 : vector<1x64xf32> to vector<8x64xf32>
    %5 = arith.addf %2, %4 : vector<8x64xf32>
    %cst_4 = arith.constant 0.000000e+00 : f32
    %6 = vector.broadcast %cst_4 : f32 to vector<8x64xf32>
    %7 = arith.maximumf %5, %6 : vector<8x64xf32>
    %c40 = arith.constant 40 : index
    %c0_5 = arith.constant 0 : index
    %8 = vector.load %arg1[%c40, %c0_5] : memref<184x64xf32, #tpu.memory_space<vmem>>, vector<64x32xf32>
    %cst_6 = arith.constant dense<0.000000e+00> : vector<8x32xf32>
    %9 = tpu.matmul %7, %8, %cst_6 {dimension_numbers = #tpu.dot_dimension_numbers<[1], [0], [0], [1], [0, 0, 1, 1], [], []>} : vector<8x64xf32>, vector<64x32xf32>, vector<8x32xf32> -> vector<8x32xf32>
    %c1 = arith.constant 1 : index
    %c0_7 = arith.constant 0 : index
    %10 = vector.load %arg1[%c1, %c0_7] : memref<184x64xf32, #tpu.memory_space<vmem>>, vector<1x32xf32>
    %11 = vector.broadcast %10 : vector<1x32xf32> to vector<8x32xf32>
    %12 = arith.addf %9, %11 : vector<8x32xf32>
    %13 = vector.extract_strided_slice %12 {offsets = [0, 0], sizes = [8, 16], strides = [1, 1]} : vector<8x32xf32> to vector<8x16xf32>
    %14 = vector.extract_strided_slice %12 {offsets = [0, 16], sizes = [8, 16], strides = [1, 1]} : vector<8x32xf32> to vector<8x16xf32>
    %c104 = arith.constant 104 : index
    %c0_8 = arith.constant 0 : index
    %15 = vector.load %arg1[%c104, %c0_8] : memref<184x64xf32, #tpu.memory_space<vmem>>, vector<16x64xf32>
    %cst_9 = arith.constant dense<0.000000e+00> : vector<8x64xf32>
    %16 = tpu.matmul %13, %15, %cst_9 {dimension_numbers = #tpu.dot_dimension_numbers<[1], [0], [0], [1], [0, 0, 1, 1], [], []>} : vector<8x16xf32>, vector<16x64xf32>, vector<8x64xf32> -> vector<8x64xf32>
    %c2 = arith.constant 2 : index
    %c0_10 = arith.constant 0 : index
    %17 = vector.load %arg1[%c2, %c0_10] : memref<184x64xf32, #tpu.memory_space<vmem>>, vector<1x64xf32>
    %18 = vector.broadcast %17 : vector<1x64xf32> to vector<8x64xf32>
    %19 = arith.addf %16, %18 : vector<8x64xf32>
    %cst_11 = arith.constant 0.000000e+00 : f32
    %20 = vector.broadcast %cst_11 : f32 to vector<8x64xf32>
    %21 = arith.maximumf %19, %20 : vector<8x64xf32>
    %c120 = arith.constant 120 : index
    %c0_12 = arith.constant 0 : index
    %22 = vector.load %arg1[%c120, %c0_12] : memref<184x64xf32, #tpu.memory_space<vmem>>, vector<64x32xf32>
    %cst_13 = arith.constant dense<0.000000e+00> : vector<8x32xf32>
    %23 = tpu.matmul %21, %22, %cst_13 {dimension_numbers = #tpu.dot_dimension_numbers<[1], [0], [0], [1], [0, 0, 1, 1], [], []>} : vector<8x64xf32>, vector<64x32xf32>, vector<8x32xf32> -> vector<8x32xf32>
    %c3 = arith.constant 3 : index
    %c0_14 = arith.constant 0 : index
    %24 = vector.load %arg1[%c3, %c0_14] : memref<184x64xf32, #tpu.memory_space<vmem>>, vector<1x32xf32>
    %25 = vector.broadcast %24 : vector<1x32xf32> to vector<8x32xf32>
    %26 = arith.addf %23, %25 : vector<8x32xf32>
    %cst_15 = arith.constant 1.000000e+00 : f32
    %27 = vector.broadcast %cst_15 : f32 to vector<8x16xf32>
    %28 = arith.addf %27, %14 : vector<8x16xf32>
    %29 = arith.mulf %13, %13 : vector<8x16xf32>
    %30 = arith.subf %28, %29 : vector<8x16xf32>
    %31 = math.exp %14 : vector<8x16xf32>
    %32 = arith.subf %30, %31 : vector<8x16xf32>
    %cst_16 = arith.constant dense<0.000000e+00> : vector<8xf32>
    %33 = vector.multi_reduction <add>, %32, %cst_16 [1] : vector<8x16xf32> to vector<8xf32>
    %34 = vector.shape_cast %33 : vector<8xf32> to vector<8x1xf32>
    %35 = tpu.iota {dimensions = array<i32: 0>} : vector<8x1xi32>
    %c2_i32 = arith.constant 2 : i32
    %36 = vector.broadcast %c2_i32 : i32 to vector<8x1xi32>
    %37 = arith.cmpi slt, %35, %36 : vector<8x1xi32>
    %cst_17 = arith.constant 0.000000e+00 : f32
    %38 = vector.broadcast %cst_17 : f32 to vector<8x1xf32>
    %39 = arith.select %37, %34, %38 : vector<8x1xi1>, vector<8x1xf32>
    %cst_18 = arith.constant dense<0.000000e+00> : vector<1xf32>
    %40 = vector.multi_reduction <add>, %39, %cst_18 [0] : vector<8x1xf32> to vector<1xf32>
    %41 = vector.shape_cast %40 : vector<1xf32> to vector<1x1xf32>
    %cst_19 = arith.constant -2.500000e-01 : f32
    %42 = vector.broadcast %cst_19 : f32 to vector<1x1xf32>
    %43 = arith.mulf %41, %42 : vector<1x1xf32>
    %cst_20 = arith.constant 1.000000e+08 : f32
    %44 = vector.broadcast %cst_20 : f32 to vector<1x1xf32>
    %45 = arith.mulf %43, %44 : vector<1x1xf32>
    %cst_21 = arith.constant 0.000000e+00 : f32
    %46 = vector.broadcast %cst_21 : f32 to vector<1x1xf32>
    %47 = arith.subf %46, %45 : vector<1x1xf32>
    %c0_22 = arith.constant 0 : index
    %c0_23 = arith.constant 0 : index
    %48 = vector.load %arg2[%c0_22, %c0_23] : memref<8x128xf32, #tpu.memory_space<vmem>>, vector<8x32xf32>
    tpu.vector_store %arg2[%c0_22, %c0_23], %26 {strides = array<i32>} : memref<8x128xf32, #tpu.memory_space<vmem>>, vector<8x32xf32>,
    %c0_24 = arith.constant 0 : index
    %c32 = arith.constant 32 : index
    %49 = vector.load %arg2[%c0_24, %c32] : memref<8x128xf32, #tpu.memory_space<vmem>>, vector<8x32xf32>
    tpu.vector_store %arg2[%c0_24, %c32], %12 {strides = array<i32>} : memref<8x128xf32, #tpu.memory_space<vmem>>, vector<8x32xf32>,
    %50 = vector.shape_cast %47 : vector<1x1xf32> to vector<1x1xf32>
    %51 = vector.broadcast %50 : vector<1x1xf32> to vector<8x64xf32>
    %c0_25 = arith.constant 0 : index
    %c64 = arith.constant 64 : index
    %52 = vector.load %arg2[%c0_25, %c64] : memref<8x128xf32, #tpu.memory_space<vmem>>, vector<8x64xf32>
    tpu.vector_store %arg2[%c0_25, %c64], %51 {strides = array<i32>} : memref<8x128xf32, #tpu.memory_space<vmem>>, vector<8x64xf32>,
    return
  }
}

</mosaic_0001>

<bundles_post_ra>
// kernel: tpu_custom_call.1
= control target key start
LH: loop header
LB: loop body
LE: loop exit
PB: predicated region body
PF: predicated region fallthrough
CT: control target
= control target key end

     0   :  { %v560_v3 = vmov 0.0|0.0   ;;  %vm561_vm0 = vmmov 0   ;;  %v562_v6 = vmov 0.0   ;;  %s696_s0 = inlined_call_operand.vmem [shape: f32[8,32], index: 0, kind: input, shape index: {}]   ;;  %s697_s1 = inlined_call_operand.vmem [shape: f32[184,64], index: 1, kind: input, shape index: {}]   ;;  %s698_s2 = inlined_call_operand.hbm [shape: f32[8,128], index: 2, kind: output, shape index: {}]  }
   0x1   :  { %v13_v0 = vld [vmem:[%s697_s1 + $0x8] sm:$0xff]  ;;  %v14_v1 = vld [vmem:[%s697_s1 + $0x10] sm:$0xff]  ;;  %v15_v2 = vld [vmem:[%s697_s1 + $0x18] sm:$0xff]  ;;  %494 = vmatprep.subr.bf16.mxu1 %v560_v3  ;;  %446 = vmatprep.mubr.msk.f32.mxu1 %vm561_vm0, %v562_v6 }
   0x2   :  { %v495_v4 = vpack.c.bf16 %v14_v1, %v13_v0  ;;  %v16_v5 = vld [vmem:[%s697_s1 + $0x20] sm:$0xff]  ;;  %512 = vmatprep.subr.bf16.mxu0 %v560_v3  ;;  %472 = vmatprep.mubr.msk.f32.mxu0 %vm561_vm0, %v562_v6  ;;  %v97_v8 = vld [vmem:[%s697_s1 + $0x28] sm:$0xff]  ;;  %v98_v9 = vld [vmem:[%s697_s1 + $0x30] sm:$0xff] }
   0x3   :  { %v498_v7 = vpack.c.bf16 %v16_v5, %v15_v2 }
   0x4   :  { %496 = vmatpush3.bf16.msra.mxu1 %v495_v4 }
   0x5   :  { %497 = vmatprep.subr.bf16.mxu1 %v560_v3 }
   0x6   :  { %7 = vsyncpa [#allocation3], 0  ;;  %v12_v10 = vld [vmem:[%s696_s0] sm:$0xff]  ;;  %vm22_vm1 = vcmask 261120   ;;  %v501_v11 = vpack.c.bf16 %v98_v9, %v97_v8  ;;  %v99_v12 = vld [vmem:[%s697_s1 + $0x38] sm:$0xff]  ;;  %vm110_vm2 = vcmask 523264   ;;  %v369_v59 = vlaneseq }
   0x7   :  { %v100_v13 = vld [vmem:[%s697_s1 + $0x40] sm:$0xff]  ;;  %v101_v15 = vld [vmem:[%s697_s1 + $0x48] sm:$0xff]  ;;  %v102_v16 = vld [vmem:[%s697_s1 + $0x50] sm:$0xff]  ;;  %vm191_vm3 = vcmask 130048   ;;  %s563_s22 = smov 16   ;;  %s564_s30 = smov 112  }
   0x8   :  { %499 = vmatpush3.bf16.msra.mxu1 %v498_v7  ;;  %v504_v14 = vpack.c.bf16 %v100_v13, %v99_v12  ;;  %v507_v17 = vpack.c.bf16 %v102_v16, %v101_v15  ;;  %v103_v18 = vld [vmem:[%s697_s1 + $0x58] sm:$0xff]  ;;  %v104_v19 = vld [vmem:[%s697_s1 + $0x60] sm:$0xff]  ;;  %v184_v26 = vld [vmem:[%s697_s1 + $0x68] sm:$0xff]  ;;  %s565_s5 = smov 32   ;;  %v370_v60 = vshrl.u32 %v369_v59, 7  ;;  %s566_s8 = smov [#allocation2]  }
   0x9   :  { %500 = vmatprep.subr.bf16.mxu1 %v560_v3  ;;  %v510_v20 = vpack.c.bf16 %v104_v19, %v103_v18  ;;  %v404_v21 = vld [vmem:[%s697_s1] ss:$0 sm:$0xff]  ;;  %v185_v27 = vld [vmem:[%s697_s1 + $0x70] sm:$0xff]  ;;  %v266_v29 = vld [vmem:[%s697_s1 + $0x78] sm:$0xff]  ;;  %s396_s9 = sshll.u32 %s566_s8, 4  ;;  %vm386_vm5 = vcmask 523520   ;;  %s397_s9 = int_to_ptr.vmem [resolvable:$true] %s396_s9 }
   0xa   :  { %v513_v28 = vpack.c.bf16 %v185_v27, %v184_v26  ;;  %v267_v30 = vld [vmem:[%s697_s1 + $0x80] sm:$0xff]  ;;  %v268_v36 = vld [vmem:[%s697_s1 + $0x88] sm:$0xff]  ;;  %v269_v37 = vld [vmem:[%s697_s1 + $0x90] sm:$0xff]  ;;  %vm371_vm4 = vcmp.lt.s32.totalorder %v370_v60, 2  ;;  %vm388_vm6 = vcmask 1048064   ;;  %s536_s10 = scalar_lea.vmem %s397_s9, 128  ;;  %p541_p1 = scmp.lt.s32.totalorder %s397_s9, %s397_s9 }
   0xb   :  { %447 = vmatmul.mubr.msk.f32.vlgmr.msra.gmra.mrb[0].mxu1 %vm22_vm1, %v12_v10  ;;  %v406_v31 = vld [vmem:[%s697_s1 + $0x1] ss:$0 sm:$0xff]  ;;  %v516_v33 = vpack.c.bf16 %v267_v30, %v266_v29  ;;  %v519_v39 = vpack.c.bf16 %v269_v37, %v268_v36  ;;  %v270_v40 = vld [vmem:[%s697_s1 + $0x98] sm:$0xff]  ;;  %v272_v43 = vld [vmem:[%s697_s1 + $0xa8] sm:$0xff]  ;;  %p537_p0 = scmp.ne.s32.totalorder %s397_s9, %s536_s10  ;;  %p542_p2 = scmp.lt.s32.totalorder %s536_s10, %s536_s10 }
   0xc   :  { %502 = vmatpush3.bf16.msra.mxu1 %v501_v11  ;;  %465 = vmatprep.mubr.msk.f32.mxu1 %vm561_vm0, %v562_v6  ;;  %v271_v41 = vld [vmem:[%s697_s1 + $0xa0] sm:$0xff]  ;;  %v273_v44 = vld [vmem:[%s697_s1 + $0xb0] sm:$0xff] }
   0xd   :  { %503 = vmatprep.subr.bf16.mxu1 %v560_v3  ;;  %514 = vmatpush3.bf16.msra.mxu0 %v513_v28  ;;  %v522_v42 = vpack.c.bf16 %v271_v41, %v270_v40  ;;  %v525_v45 = vpack.c.bf16 %v273_v44, %v272_v43  ;;  %v408_v52 = vld [vmem:[%s697_s1 + $0x2] ss:$0 sm:$0xff]  ;;  %p543_p3 = por %p542_p2, %p541_p1 }
   0xe   :  { %515 = vmatprep.subr.bf16.mxu0 %v560_v3 }
   0xf   :  { %p544_p4 = pnand %p543_p3, %p537_p0 }
  0x10   :  { %505 = vmatpush3.bf16.msra.mxu1 %v504_v14 }
  0x11   :  { %506 = vmatprep.subr.bf16.mxu1 %v560_v3 }
  0x14   :  { %508 = vmatpush3.bf16.msra.mxu1 %v507_v17 }
  0x15   :  { %509 = vmatprep.subr.bf16.mxu1 %v560_v3 }
  0x18   :  { %511 = vmatpush3.bf16.msra.mxu1 %v510_v20 }
  0xde   :  { %v92_v22 = vpop.f32.mrb[0].mxu1 }
  0xdf   :  { %v93_v23 = vadd.f32 %v404_v21, %v92_v22  ;;  %v448_v24 = vpop.f32.mrb[1].mxu1 }
  0xe1   :  { %v96_v25 = vmax.f32 %v93_v23, 0.0 }
  0xe3   :  { %466 = vmatmul.mubr.msk.f32.vlgmr.msra.gmra.mrb[2].mxu1 %vm110_vm2, %v96_v25 }
 0x1b6   :  { %v180_v32 = vpop.f32.mrb[2].mxu1 }
 0x1b7   :  { %v181_v34 = vadd.f32 %v406_v31, %v180_v32  ;;  %v467_v35 = vpop.f32.mrb[3].mxu1 }
 0x1b9   :  { %473 = vmatmul.mubr.msk.f32.vlgmr.msra.gmra.mrb[0].mxu0 %vm191_vm3, %v181_v34  ;;  %v353_v38 = vmul.f32 %v181_v34, %v181_v34  ;;  %v359_v46 = vmul.f32 1.442695, %v181_v34  ;;  %v352_v47 = vadd.f32 1.0, %v181_v34 }
 0x1ba   :  { %517 = vmatpush3.bf16.msra.mxu0 %v516_v33  ;;  %491 = vmatprep.mubr.msk.f32.mxu0 %vm561_vm0, %v562_v6  ;;  %v410_v6 = vld [vmem:[%s697_s1 + $0x3] ss:$0 sm:$0xff] }
 0x1bb   :  { %355 = vrot.lane.b32.xlu0 %v353_v38, %s563_s22  ;;  %518 = vmatprep.subr.bf16.mxu0 %v560_v3  ;;  %534 = vpow2.f32 %v359_v46 }
 0x1be   :  { %520 = vmatpush3.bf16.msra.mxu0 %v519_v39 }
 0x1bf   :  { %521 = vmatprep.subr.bf16.mxu0 %v560_v3 }
 0x1c2   :  { %523 = vmatpush3.bf16.msra.mxu0 %v522_v42 }
 0x1c3   :  { %524 = vmatprep.subr.bf16.mxu0 %v560_v3 }
 0x1c5   :  { %v535_v50 = vpop.eup %534 }
 0x1c6   :  { %526 = vmatpush3.bf16.msra.mxu0 %v525_v45 }
 0x22d   :  { %v356_v48 = vpop.permute.xlu0 %355 }
 0x22e   :  { %v358_v49 = vsub.f32 %v352_v47, %v356_v48 }
 0x230   :  { %v361_v51 = vsub.f32 %v358_v49, %v535_v50 }
 0x232   :  { %363 = vrot.lane.b32.xlu0 %v361_v51, %s564_s30 }
 0x28c   :  { %v261_v53 = vpop.f32.mrb[0].mxu0 }
 0x28d   :  { %v262_v54 = vadd.f32 %v408_v52, %v261_v53  ;;  %v474_v55 = vpop.f32.mrb[1].mxu0 }
 0x28f   :  { %v265_v56 = vmax.f32 %v262_v54, 0.0 }
 0x291   :  { %492 = vmatmul.mubr.msk.f32.vlgmr.msra.gmra.mrb[2].mxu0 %vm110_vm2, %v265_v56 }
 0x2a4   :  { %v364_v57 = vpop.permute.xlu0 %363 }
 0x2a5   :  { %v366_v58 = vsel %vm191_vm3, %v364_v57, 0.0 }
 0x2a6   :  { %367 = vadd.xlane.f32.xlu1 %v366_v58 }
 0x2b7   :  { %383 = vrot.lane.b32.xlu1 %v181_v34, %s565_s5 }
 0x333   :  { %v368_v61 = vpop.xlane.xlu1 %367 }
 0x334   :  { %v372_v62 = vsel %vm371_vm4, %v368_v61, 0.0 }
 0x335   :  { %v373_v63 = vrot.slane %v372_v62, 4 }
 0x337   :  { %v374_v0 = vadd.f32 %v373_v63, %v372_v62  ;;  %v384_v11 = vpop.permute.xlu1 %383 }
 0x339   :  { %v375_v1 = vrot.slane %v374_v0, 2 }
 0x33b   :  { %v376_v2 = vadd.f32 %v375_v1, %v374_v0 }
 0x33d   :  { %v377_v3 = vrot.slane %v376_v2, 1 }
 0x33f   :  { %v378_v4 = vadd.f32 %v377_v3, %v376_v2 }
 0x341   :  { %v379_v5 = vmul.f32 -0.25, %v378_v4 }
 0x343   :  { %v380_v7 = vmul.f32 1e+08, %v379_v5 }
 0x345   :  { %v381_v12 = vsub.f32 0.0, %v380_v7 }
 0x364   :  { %v348_v8 = vpop.f32.mrb[2].mxu0 }
 0x365   :  { %v349_v9 = vadd.f32 %v410_v6, %v348_v8  ;;  %v493_v10 = vpop.f32.mrb[3].mxu0 }
 0x367   :  { %382 = vst.msk [vmem:[#allocation2] sm:$0xff] %vm22_vm1, %v349_v9 }
 0x368   :  { %387 = vst.msk [vmem:[#allocation2] sm:$0xff] %vm386_vm5, %v384_v11 }
 0x369   :  { %389 = vst.msk [vmem:[#allocation2] sm:$0xff] %vm388_vm6, %v381_v12 }
 0x36a   :  { %547 = shalt.err (!%p544_p4)
}
 0x36b   :  { %s548_s12 = scalar_lea.hbm %s698_s2, 128 }
 0x36c   :  { %p549_p5 = scmp.ne.s32.totalorder %s698_s2, %s548_s12  ;;  %p552_p6 = scmp.lt.u32.totalorder %s548_s12, %s698_s2 }
 0x36e   :  { %p554_p7 = pnand %p552_p6, %p549_p5 }
 0x370   :  { %557 = shalt.err (!%p554_p7)
}
 0x371   :  { %399 = dma.vmem_to_hbm [thread:$0]  %s397_s9, 128, %s698_s2, [#allocation3]  }
 0x372   :  { %558 = dma.done.wait [#allocation3], 128  }
 0x373   :  { %559 = vsyncadd [#allocation3], 4294967168 }
 0x374   :  { %403 = vsyncpa [#allocation3], 1 }

</bundles_post_ra>
